<compile_context>
chip_gen: v7x
topology: tpu7x:2x2x1
jax: 0.10.0
libtpu: 0.0.40
codegen_flags: <defaults>
</compile_context>

<pallas_src>
import functools

import numpy as np
import jax
import jax.numpy as jnp
from jax import lax
from jax.experimental import pallas as pl
from jax.experimental.pallas import tpu as pltpu

_MAX_PACKED_D = 16          # packed path costs D lane-rolls per block


# --------------------------------------------------------------------------
# Tiling helpers
# --------------------------------------------------------------------------
def _round_up8(n):
    return -(-n // 8) * 8


def _vmem_budget():
    """(live-block budget bytes, vmem_limit_bytes) scaled to this chip's VMEM."""
    try:
        cap = int(pltpu.get_tpu_info().vmem_capacity_bytes)
    except Exception:
        cap = 64 * 1024 * 1024              # assume the smallest (v7x per-TC)
    budget = cap // 3                        # live double-buffered block bytes
    limit = min(cap // 2, budget + (16 << 20))
    return budget, limit


def _pick_row_tile(num_rows, row_bytes, budget_bytes, min_steps=8):
    """Rows per block: a multiple of 8 (or the full extent), small enough that
    double-buffered in+out blocks fit the budget, and small enough to give
    >= min_steps grid steps (DMA/compute overlap + v7x megacore sharding)."""
    if num_rows <= 8:
        return num_rows
    max_rows = max(8, (budget_bytes // (4 * max(1, row_bytes))) // 8 * 8)
    tb = min(_round_up8(num_rows), max_rows)
    steps = min(min_steps, num_rows // 8)
    if steps >= 2:
        tb = min(tb, _round_up8(pl.cdiv(num_rows, steps)))
    tb = max(8, tb)
    return num_rows if tb >= num_rows else tb


def _pick_col_tile(num_cols, max_cols=2048):
    """Feature-axis block: full extent unless D is a large multiple of 128, in
    which case use the largest 128-aligned divisor <= max_cols so wide rows
    stay pipelined and lane blocks stay dense."""
    if num_cols % 128 != 0 or num_cols <= max_cols:
        return num_cols
    for cand in range(max_cols, 127, -128):
        if num_cols % cand == 0:
            return cand
    return 128


# --------------------------------------------------------------------------
# pltpu.roll direction probe (one-time)
# --------------------------------------------------------------------------
_ROLL_SIGN = None


def _roll_sign():
    """+1 if pltpu.roll follows jnp.roll semantics (out[i] = x[(i - shift) % n]),
    -1 if it rolls the other way.  Probed once so the packed small-D flip is
    exact regardless of the convention."""
    global _ROLL_SIGN
    if _ROLL_SIGN is None:
        def probe(x_ref, o_ref):
            o_ref[...] = pltpu.roll(x_ref[...], shift=1, axis=1)

        x = jnp.broadcast_to(jnp.arange(128, dtype=jnp.int32), (8, 128))
        r = pl.pallas_call(
            probe, out_shape=jax.ShapeDtypeStruct((8, 128), jnp.int32))(x)
        _ROLL_SIGN = 1 if int(jax.device_get(r)[0, 1]) == 0 else -1
    return _ROLL_SIGN


# --------------------------------------------------------------------------
# Kernels
# --------------------------------------------------------------------------
def _rev_lanes_kernel(x_ref, y_ref):
    # Plain path: lane (feature-axis) reverse of the block — XLU only.
    y_ref[...] = lax.rev(x_ref[...], dimensions=(1,))


def _rev_packed_kernel(x_ref, y_ref, *, width, roll_sign):
    # Packed small-D path: block is (tb, 128) holding 128//width rows of width
    # features each.  Flip each width-sized group in place with static lane
    # rolls + selects; loads and stores stay lane-dense.
    x = x_ref[...]
    lane = lax.broadcasted_iota(jnp.int32, x.shape, 1)
    pos = lane & (width - 1)                      # width is a power of two
    out = x
    for k in range(width):
        src_off = (width - 1) - 2 * k             # out lane l (pos==k) <- x[l + src_off]
        if src_off == 0:
            continue
        shift = (roll_sign * (-src_off)) % 128
        rolled = pltpu.roll(x, shift=shift, axis=1)
        out = jnp.where(pos == k, rolled, out)
    y_ref[...] = out


# --------------------------------------------------------------------------
# Wrapper paths
# --------------------------------------------------------------------------
def _reverse_packed(x, budget_bytes, vmem_limit):
    B, D = x.shape
    g = 128 // D
    pad = (-B) % g
    if pad:
        x = jnp.pad(x, ((0, pad), (0, 0)))
    Bp = B + pad
    R = Bp // g
    xp = x.reshape(R, 128)                        # contiguous view, lane-dense
    itemsize = jnp.dtype(x.dtype).itemsize
    tb = _pick_row_tile(R, 128 * itemsize, budget_bytes)
    kernel = functools.partial(_rev_packed_kernel, width=D,
                               roll_sign=_roll_sign())
    out = pl.pallas_call(
        kernel,
        out_shape=jax.ShapeDtypeStruct((R, 128), x.dtype),
        grid=(pl.cdiv(R, tb),),
        in_specs=[pl.BlockSpec((tb, 128), lambda i: (i, 0))],
        out_specs=pl.BlockSpec((tb, 128), lambda i: (i, 0)),
        compiler_params=pltpu.CompilerParams(
            dimension_semantics=("parallel",),
            vmem_limit_bytes=vmem_limit),
    )(xp)
    out = out.reshape(Bp, D)
    return out[:B] if pad else out


def _reverse_plain(x, budget_bytes, vmem_limit):
    B, D = x.shape
    itemsize = jnp.dtype(x.dtype).itemsize
    td = _pick_col_tile(D)
    nD = D // td if td < D else 1
    tb = _pick_row_tile(B, td * itemsize, budget_bytes)
    out = pl.pallas_call(
        _rev_lanes_kernel,
        out_shape=jax.ShapeDtypeStruct((B, D), x.dtype),
        grid=(pl.cdiv(B, tb), nD),
        # Output feature block j is the in-block-reversed input block nD-1-j.
        in_specs=[pl.BlockSpec((tb, td), lambda i, j: (i, nD - 1 - j))],
        out_specs=pl.BlockSpec((tb, td), lambda i, j: (i, j)),
        compiler_params=pltpu.CompilerParams(
            dimension_semantics=("parallel", "parallel"),
            vmem_limit_bytes=vmem_limit),
    )(x)
    return out


def _reverse_features(x):
    B, D = x.shape
    if D == 1:
        return x
    budget, vmem_limit = _vmem_budget()
    if D < 128 and 128 % D == 0 and D <= _MAX_PACKED_D:
        return _reverse_packed(x, budget, vmem_limit)
    return _reverse_plain(x, budget, vmem_limit)


# --------------------------------------------------------------------------
# Module
# --------------------------------------------------------------------------
class ReversePallas:
    """JAX/Pallas equivalent of the PyTorch `Reverse` module."""

    def __init__(self, num_inputs):
        self.num_inputs = num_inputs
        self.perm = np.array(np.arange(0, num_inputs)[::-1])
        self.inv_perm = np.argsort(self.perm)

    def __call__(self, inputs, cond_inputs=None, mode="direct"):
        B, D = inputs.shape
        assert D == self.num_inputs
        # perm and inv_perm are both the feature reversal -> same kernel for
        # 'direct' and 'inverse'.
        out = _reverse_features(inputs)
        # Log-determinant of a permutation is exactly 0 — produced in the
        # wrapper (no lane-width-1 kernel output / masked stores).
        logdet = jnp.zeros((B, 1), dtype=jnp.float32)
        return out, logdet


if __name__ == "__main__":
    # Case 1: flow-layer shape (small D) -> lane-dense packed path.
    B, D = 8, 8
    x = jax.random.normal(jax.random.PRNGKey(0), (B, D), dtype=jnp.float32)
    layer = ReversePallas(num_inputs=D)
    y, logdet = layer(x, mode="direct")
    y = jax.block_until_ready(y)
    x_back, logdet_inv = layer(y, mode="inverse")
    x_back = jax.block_until_ready(x_back)
    x_np = np.asarray(x)
    assert np.array_equal(np.asarray(y), x_np[:, layer.perm]), "direct mismatch"
    assert np.array_equal(np.asarray(x_back), x_np), "inverse round-trip mismatch"
    assert logdet.shape == (B, 1) and np.all(np.asarray(logdet) == 0.0)
    assert np.all(np.asarray(logdet_inv) == 0.0)

    # Case 2: packed small-D path with a multi-step row grid.
    B2, D2 = 1024, 8
    x2 = jax.random.normal(jax.random.PRNGKey(1), (B2, D2), dtype=jnp.float32)
    layer2 = ReversePallas(num_inputs=D2)
    y2, _ = layer2(x2, mode="direct")
    y2 = jax.block_until_ready(y2)
    assert np.array_equal(np.asarray(y2), np.asarray(x2)[:, layer2.perm]), \
        "packed multi-step mismatch"

    # Case 3: lane-aligned D (plain path, single feature block, 8-step grid).
    B3, D3 = 64, 128
    x3 = jax.random.normal(jax.random.PRNGKey(2), (B3, D3), dtype=jnp.float32)
    layer3 = ReversePallas(num_inputs=D3)
    y3, _ = layer3(x3, mode="direct")
    y3 = jax.block_until_ready(y3)
    assert np.array_equal(np.asarray(y3), np.asarray(x3)[:, layer3.perm]), \
        "plain single-block mismatch"

    # Case 4: wide D exercising the reversed feature-block index_map.
    B4, D4 = 64, 4096
    x4 = jax.random.normal(jax.random.PRNGKey(3), (B4, D4), dtype=jnp.float32)
    layer4 = ReversePallas(num_inputs=D4)
    y4, _ = layer4(x4, mode="direct")
    y4 = jax.block_until_ready(y4)
    assert np.array_equal(np.asarray(y4), np.asarray(x4)[:, layer4.perm]), \
        "tiled feature-axis mismatch"

    print("KERNEL_OK")
</pallas_src>

<mosaic_0001>
module attributes {stable_mosaic.version = 11 : i64} {
  func.func @probe(%arg0: memref<8x128xi32, #tpu.memory_space<vmem>>, %arg1: memref<8x128xi32, #tpu.memory_space<vmem>>) attributes {dimension_semantics = [], scalar_prefetch = 0 : i64, scratch_operands = 0 : i64, tpu.core_type = #tpu.core_type<tc>} {
    %c0 = arith.constant 0 : index
    %c0_0 = arith.constant 0 : index
    %0 = vector.load %arg0[%c0, %c0_0] : memref<8x128xi32, #tpu.memory_space<vmem>>, vector<8x128xi32>
    %c1_i32 = arith.constant 1 : i32
    %1 = tpu.dynamic_rotate %0 by %c1_i32 dim 1 : vector<8x128xi32>, i32 -> vector<8x128xi32>
    %c0_1 = arith.constant 0 : index
    %c0_2 = arith.constant 0 : index
    %2 = vector.load %arg1[%c0_1, %c0_2] : memref<8x128xi32, #tpu.memory_space<vmem>>, vector<8x128xi32>
    tpu.vector_store %arg1[%c0_1, %c0_2], %1 {strides = array<i32>} : memref<8x128xi32, #tpu.memory_space<vmem>>, vector<8x128xi32>,
    return
  }
}

</mosaic_0001>

<bundles_post_ra>
// kernel: tpu_custom_call.1
= control target key start
LH: loop header
LB: loop body
LE: loop exit
PB: predicated region body
PF: predicated region fallthrough
CT: control target
= control target key end

     0   :  { %6 = vsyncpa [#allocation3], 0  ;;  %s128_s0 = inlined_call_operand.hbm [shape: s32[8,128], index: 0, kind: input, shape index: {}]   ;;  %s129_s1 = inlined_call_operand.hbm [shape: s32[8,128], index: 1, kind: output, shape index: {}]  }
   0x1   :  { %7 = vsyncpa [#allocation4], 0  ;;  %s91_s6 = smov [#allocation2]   ;;  %s43_s10 = scalar_lea.hbm %s128_s0, 128 }
   0x2   :  { %s14_s7 = sshll.u32 %s91_s6, 4  ;;  %p44_p0 = scmp.ne.s32.totalorder %s128_s0, %s43_s10  ;;  %s15_s7 = int_to_ptr.vmem [resolvable:$true] %s14_s7 }
   0x3   :  { %p47_p1 = scmp.lt.u32.totalorder %s43_s10, %s128_s0 }
   0x5   :  { %p49_p2 = pnand %p47_p1, %p44_p0 }
   0x7   :  { %52 = shalt.err (!%p49_p2)
}
   0x8   :  { %s53_s15 = scalar_lea.vmem %s15_s7, 128  ;;  %p58_p4 = scmp.lt.s32.totalorder %s15_s7, %s15_s7 }
   0x9   :  { %p54_p3 = scmp.ne.s32.totalorder %s15_s7, %s53_s15  ;;  %p59_p5 = scmp.lt.s32.totalorder %s53_s15, %s53_s15 }
   0xb   :  { %p60_p6 = por %p59_p5, %p58_p4 }
   0xd   :  { %p61_p7 = pnand %p60_p6, %p54_p3 }
   0xf   :  { %64 = shalt.err (!%p61_p7)
}
  0x10   :  { %17 = dma.hbm_to_vmem [thread:$0]  %s128_s0, 128, %s15_s7, [#allocation3]  }
  0x11   :  { %87 = dma.done.wait [#allocation3], 128  }
  0x12   :  { %88 = vsyncadd [#allocation3], 4294967168  ;;  %v21_v0 = vld [vmem:[#allocation2] sm:$0xff]  ;;  %s92_s18 = smov 1   ;;  %s93_s19 = smov [#allocation5]  }
  0x13   :  { %22 = vrot.lane.b32.xlu0 %v21_v0, %s92_s18  ;;  %s31_s20 = sshll.u32 %s93_s19, 4  ;;  %s32_s20 = int_to_ptr.vmem [resolvable:$true] %s31_s20 }
  0x14   :  { %s65_s21 = scalar_lea.vmem %s32_s20, 128  ;;  %p70_p9 = scmp.lt.s32.totalorder %s32_s20, %s32_s20 }
  0x15   :  { %p66_p8 = scmp.ne.s32.totalorder %s32_s20, %s65_s21  ;;  %p71_p10 = scmp.lt.s32.totalorder %s65_s21, %s65_s21 }
  0x17   :  { %p72_p11 = por %p71_p10, %p70_p9 }
  0x19   :  { %p73_p12 = pnand %p72_p11, %p66_p8 }
  0x85   :  { %v23_v1 = vpop.permute.xlu0 %22 }
  0x86   :  { %24 = vst [vmem:[#allocation5] sm:$0xff] %v23_v1 }
  0x87   :  { %76 = shalt.err (!%p73_p12)
}
  0x88   :  { %s77_s0 = scalar_lea.hbm %s129_s1, 128 }
  0x89   :  { %p78_p13 = scmp.ne.s32.totalorder %s129_s1, %s77_s0  ;;  %p81_p0 = scmp.lt.u32.totalorder %s77_s0, %s129_s1 }
  0x8b   :  { %p83_p1 = pnand %p81_p0, %p78_p13 }
  0x8d   :  { %86 = shalt.err (!%p83_p1)
}
  0x8e   :  { %34 = dma.vmem_to_hbm [thread:$0]  %s32_s20, 128, %s129_s1, [#allocation4]  }
  0x8f   :  { %89 = dma.done.wait [#allocation4], 128  }
  0x90   :  { %90 = vsyncadd [#allocation4], 4294967168 }
  0x91   :  { %38 = vsyncpa [#allocation3], 1 }
  0x92   :  { %39 = vsyncpa [#allocation4], 1 }

</bundles_post_ra>
